<compile_context>
chip_gen: v7x
topology: tpu7x:2x2x1
jax: 0.10.0
libtpu: 0.0.40
codegen_flags: <defaults>
</compile_context>

<pallas_src>
import jax
import jax.numpy as jnp
from jax.experimental import pallas as pl
from jax.experimental.pallas import tpu as pltpu  # noqa: F401  (kept for TPU-specific tuning hooks)


def dueling_kernel(x_ref, w1_ref, b1_ref, wh_ref, bh_ref, out_ref):
    B, D = x_ref.shape
    A = out_ref.shape[1]

    x = x_ref[...]
    w1 = w1_ref[...]

    # Hidden layer. For tiny contraction depth (MountainCar: D = 2) the MXU wastes
    # almost all of its systolic depth and pays full push/pop latency, so do the
    # contraction as D VPU broadcast-FMAs instead. (Static Python branch: D is a
    # compile-time constant of the Ref shape.)
    if D <= 16:
        acc = x[:, 0:1] * w1[0:1, :]
        for k in range(1, D):
            acc = acc + x[:, k:k + 1] * w1[k:k + 1, :]
    else:
        acc = jnp.dot(x, w1, preferred_element_type=jnp.float32)
    h = jnp.maximum(acc + b1_ref[...], 0.0)                      # (B, H)

    # Fused advantage|value head: (B, H) @ (H, A+1) + (1, A+1) -> single MXU matmul.
    r = jnp.dot(h, wh_ref[...], preferred_element_type=jnp.float32) + bh_ref[...]
    adv = r[:, :A]            # (B, A)  static slice (free)
    val = r[:, A:A + 1]       # (B, 1)  static slice (free)

    # Global scalar mean over the entire advantage tensor (matches PyTorch adv.mean()).
    # TODO(synk): this global mean couples all batch rows; a batch grid axis (useful on
    # v7x's dual TensorCores for large B) would need a two-phase accumulate/finalize.
    adv_mean = jnp.mean(adv)

    # val broadcasts (B, 1) -> (B, A); adv_mean broadcasts as a scalar.
    out_ref[...] = val + adv - adv_mean


def dueling_forward(x, params):
    w1, b1, wa, ba, wv, bv = params
    B, D = x.shape
    H = w1.shape[1]
    A = wa.shape[1]

    # Fuse the two heads: one (H, A+1) weight, one (1, A+1) bias.  Done once in the
    # wrapper (constant-folded under jit), removes two input DMAs and one matmul.
    wh = jnp.concatenate([wa, wv], axis=1)   # (H, A+1)
    bh = jnp.concatenate([ba, bv], axis=1)   # (1, A+1)

    full = lambda shape: pl.BlockSpec(shape, lambda: tuple(0 for _ in shape))

    flops = 2 * B * D * H + 2 * B * H * (A + 1) + 4 * B * A
    bytes_accessed = 4 * (B * D + D * H + H + H * (A + 1) + (A + 1) + B * A)

    return pl.pallas_call(
        dueling_kernel,
        out_shape=jax.ShapeDtypeStruct((B, A), jnp.float32),
        grid_spec=pl.GridSpec(
            grid=(),
            in_specs=[
                full((B, D)),       # x
                full((D, H)),       # w1
                full((1, H)),       # b1
                full((H, A + 1)),   # fused head weight  [w_adv | w_val]
                full((1, A + 1)),   # fused head bias    [b_adv | b_val]
            ],
            out_specs=full((B, A)),
        ),
        cost_estimate=pl.CostEstimate(
            flops=flops, transcendentals=0, bytes_accessed=bytes_accessed),
    )(x, w1, b1, wh, bh)


def init_params(key, layers, num_actions, hidden=64):
    """Deterministic init mimicking nn.Linear's uniform(-1/sqrt(fan_in), 1/sqrt(fan_in))."""
    ks = jax.random.split(key, 6)

    def lin(kw, kb, fan_in, fan_out):
        bound = 1.0 / jnp.sqrt(fan_in)
        w = jax.random.uniform(kw, (fan_in, fan_out), jnp.float32, -bound, bound)
        b = jax.random.uniform(kb, (1, fan_out), jnp.float32, -bound, bound)
        return w, b

    w1, b1 = lin(ks[0], ks[1], layers, hidden)
    wa, ba = lin(ks[2], ks[3], hidden, num_actions)
    wv, bv = lin(ks[4], ks[5], hidden, 1)
    return (w1, b1, wa, ba, wv, bv)


def reference_forward(x, params):
    """Pure-JAX reference for correctness check."""
    w1, b1, wa, ba, wv, bv = params
    h = jnp.maximum(x @ w1 + b1, 0.0)
    adv = h @ wa + ba
    val = h @ wv + bv
    return val + adv - jnp.mean(adv)


if __name__ == "__main__":
    # MountainCar: observation dim (layers) = 2, num_actions = 3. Batch = 8.
    layers, num_actions, batch = 2, 3, 8

    key = jax.random.PRNGKey(0)
    k_x, k_p = jax.random.split(key)
    x = jax.random.normal(k_x, (batch, layers), jnp.float32)
    params = init_params(k_p, layers, num_actions)

    out = jax.jit(dueling_forward)(x, params)
    out = jax.block_until_ready(out)

    ref = reference_forward(x, params)
    assert out.shape == (batch, num_actions)
    assert jnp.allclose(out, ref, atol=1e-5, rtol=1e-5), (out, ref)

    print("KERNEL_OK")
</pallas_src>

<mosaic_0001>
module attributes {stable_mosaic.version = 11 : i64} {
  func.func @dueling_kernel(%arg0: memref<8x2xf32, #tpu.memory_space<vmem>>, %arg1: memref<2x64xf32, #tpu.memory_space<vmem>>, %arg2: memref<1x64xf32, #tpu.memory_space<vmem>>, %arg3: memref<64x4xf32, #tpu.memory_space<vmem>>, %arg4: memref<1x4xf32, #tpu.memory_space<vmem>>, %arg5: memref<8x3xf32, #tpu.memory_space<vmem>>) attributes {dimension_semantics = [], scalar_prefetch = 0 : i64, scratch_operands = 0 : i64, tpu.core_type = #tpu.core_type<tc>} {
    %c0 = arith.constant 0 : index
    %c0_0 = arith.constant 0 : index
    %0 = vector.load %arg0[%c0, %c0_0] : memref<8x2xf32, #tpu.memory_space<vmem>>, vector<8x2xf32>
    %c0_1 = arith.constant 0 : index
    %c0_2 = arith.constant 0 : index
    %1 = vector.load %arg1[%c0_1, %c0_2] : memref<2x64xf32, #tpu.memory_space<vmem>>, vector<2x64xf32>
    %2 = vector.extract_strided_slice %0 {offsets = [0, 0], sizes = [8, 1], strides = [1, 1]} : vector<8x2xf32> to vector<8x1xf32>
    %3 = vector.extract_strided_slice %1 {offsets = [0, 0], sizes = [1, 64], strides = [1, 1]} : vector<2x64xf32> to vector<1x64xf32>
    %4 = vector.broadcast %2 : vector<8x1xf32> to vector<8x64xf32>
    %5 = vector.broadcast %3 : vector<1x64xf32> to vector<8x64xf32>
    %6 = arith.mulf %4, %5 : vector<8x64xf32>
    %7 = vector.extract_strided_slice %0 {offsets = [0, 1], sizes = [8, 1], strides = [1, 1]} : vector<8x2xf32> to vector<8x1xf32>
    %8 = vector.extract_strided_slice %1 {offsets = [1, 0], sizes = [1, 64], strides = [1, 1]} : vector<2x64xf32> to vector<1x64xf32>
    %9 = vector.broadcast %7 : vector<8x1xf32> to vector<8x64xf32>
    %10 = vector.broadcast %8 : vector<1x64xf32> to vector<8x64xf32>
    %11 = arith.mulf %9, %10 : vector<8x64xf32>
    %12 = arith.addf %6, %11 : vector<8x64xf32>
    %c0_3 = arith.constant 0 : index
    %c0_4 = arith.constant 0 : index
    %13 = vector.load %arg2[%c0_3, %c0_4] : memref<1x64xf32, #tpu.memory_space<vmem>>, vector<1x64xf32>
    %14 = vector.broadcast %13 : vector<1x64xf32> to vector<8x64xf32>
    %15 = arith.addf %12, %14 : vector<8x64xf32>
    %cst = arith.constant 0.000000e+00 : f32
    %16 = vector.broadcast %cst : f32 to vector<8x64xf32>
    %17 = arith.maximumf %15, %16 : vector<8x64xf32>
    %c0_5 = arith.constant 0 : index
    %c0_6 = arith.constant 0 : index
    %18 = vector.load %arg3[%c0_5, %c0_6] : memref<64x4xf32, #tpu.memory_space<vmem>>, vector<64x4xf32>
    %cst_7 = arith.constant dense<0.000000e+00> : vector<8x4xf32>
    %19 = tpu.matmul %17, %18, %cst_7 {dimension_numbers = #tpu.dot_dimension_numbers<[1], [0], [0], [1], [0, 0, 1, 1], [], []>} : vector<8x64xf32>, vector<64x4xf32>, vector<8x4xf32> -> vector<8x4xf32>
    %c0_8 = arith.constant 0 : index
    %c0_9 = arith.constant 0 : index
    %20 = vector.load %arg4[%c0_8, %c0_9] : memref<1x4xf32, #tpu.memory_space<vmem>>, vector<1x4xf32>
    %21 = vector.broadcast %20 : vector<1x4xf32> to vector<8x4xf32>
    %22 = arith.addf %19, %21 : vector<8x4xf32>
    %23 = vector.extract_strided_slice %22 {offsets = [0, 0], sizes = [8, 3], strides = [1, 1]} : vector<8x4xf32> to vector<8x3xf32>
    %24 = vector.extract_strided_slice %22 {offsets = [0, 3], sizes = [8, 1], strides = [1, 1]} : vector<8x4xf32> to vector<8x1xf32>
    %25 = vector.shape_cast %23 : vector<8x3xf32> to vector<1x8x3xf32>
    %cst_10 = arith.constant dense<0.000000e+00> : vector<1xf32>
    %26 = vector.multi_reduction <add>, %25, %cst_10 [1, 2] : vector<1x8x3xf32> to vector<1xf32>
    %27 = vector.shape_cast %26 : vector<1xf32> to vector<1x1x1xf32>
    %28 = vector.extract %27[0, 0, 0] : f32 from vector<1x1x1xf32>
    %cst_11 = arith.constant 2.400000e+01 : f32
    %29 = arith.divf %28, %cst_11 : f32
    %30 = vector.broadcast %24 : vector<8x1xf32> to vector<8x3xf32>
    %31 = arith.addf %30, %23 : vector<8x3xf32>
    %32 = vector.broadcast %29 : f32 to vector<8x3xf32>
    %33 = arith.subf %31, %32 : vector<8x3xf32>
    %c0_12 = arith.constant 0 : index
    %c0_13 = arith.constant 0 : index
    %34 = vector.load %arg5[%c0_12, %c0_13] : memref<8x3xf32, #tpu.memory_space<vmem>>, vector<8x3xf32>
    tpu.vector_store %arg5[%c0_12, %c0_13], %33 {strides = array<i32>} : memref<8x3xf32, #tpu.memory_space<vmem>>, vector<8x3xf32>,
    return
  }
}

</mosaic_0001>

<bundles_post_ra>
// kernel: dueling_forward.1
= control target key start
LH: loop header
LB: loop body
LE: loop exit
PB: predicated region body
PF: predicated region fallthrough
CT: control target
= control target key end

     0   :  { %v222_v0 = vmov 0   ;;  %v223_v2 = vmov 0.0|0.0   ;;  %v224_v11 = vmov 1   ;;  %vm225_vm0 = vmmov 0   ;;  %s299_s0 = inlined_call_operand.vmem [shape: f32[8,2], index: 0, kind: input, shape index: {}]   ;;  %s300_s3 = inlined_call_operand.vmem [shape: f32[64,4], index: 3, kind: input, shape index: {}]   ;;  %s301_s1 = inlined_call_operand.vmem [shape: f32[2,64], index: 1, kind: input, shape index: {}]   ;;  %s302_s2 = inlined_call_operand.vmem [shape: f32[1,64], index: 2, kind: input, shape index: {}]   ;;  %s303_s4 = inlined_call_operand.vmem [shape: f32[1,4], index: 4, kind: input, shape index: {}]   ;;  %s304_s5 = inlined_call_operand.vmem [shape: f32[8,3], index: 5, kind: output, shape index: {}]  }
   0x1   :  { %218 = vset.pattern.permute.xlu0 %v222_v0  ;;  %v20_v1 = vld [vmem:[%s299_s0] sm:$0xff]  ;;  %198 = vmatprep.subr.bf16.mxu0 %v223_v2  ;;  %v52_v4 = vld [vmem:[%s300_s3 + $0x8] sm:$0xff]  ;;  %v53_v6 = vld [vmem:[%s300_s3 + $0x10] sm:$0xff]  ;;  %v226_v16 = vmov 0.0   ;;  %v27_v17 = vlaneseq  ;;  %vm66_vm1 = vcmask 523264   ;;  %v227_v32 = vmov 3  }
   0x2   :  { %v51_v3 = vld [vmem:[%s300_s3] sm:$0xff]  ;;  %24 = vperm.xlu0 %218, %v20_v1   ;;  %v54_v7 = vld [vmem:[%s300_s3 + $0x18] sm:$0xff]  ;;  %v56_v10 = vld [vmem:[%s300_s3 + $0x28] sm:$0xff]  ;;  %195 = vmatprep.mubr.msk.f32.mxu0 %vm225_vm0, %v226_v16  ;;  %vm140_vm2 = vcmask 23552  }
   0x3   :  { %v199_v5 = vpack.c.bf16 %v52_v4, %v51_v3  ;;  %v202_v8 = vpack.c.bf16 %v54_v7, %v53_v6  ;;  %v55_v9 = vld [vmem:[%s300_s3 + $0x20] sm:$0xff]  ;;  %v57_v13 = vld [vmem:[%s300_s3 + $0x30] sm:$0xff]  ;;  %v58_v14 = vld [vmem:[%s300_s3 + $0x38] sm:$0xff]  ;;  %v28_v18 = vshrl.u32 %v27_v17, 7  ;;  %220 = vset.pattern.permute.xlu1 %v227_v32 }
   0x4   :  { %v205_v12 = vpack.c.bf16 %v56_v10, %v55_v9  ;;  %v208_v15 = vpack.c.bf16 %v58_v14, %v57_v13  ;;  %v21_v21 = vld [vmem:[%s301_s1] sm:$0x3] }
   0x5   :  { %200 = vmatpush3.bf16.msra.mxu0 %v199_v5  ;;  %v29_v19 = vsub.s32 0, %v28_v18  ;;  %v38_v20 = vsub.s32 1, %v28_v18  ;;  %v167_v28 = vld [vmem:[%s302_s2] ss:$0 sm:$0xff] }
   0x6   :  { %201 = vmatprep.subr.bf16.mxu0 %v223_v2  ;;  %219 = vset.pattern.permute.xlu0 %v224_v11  ;;  %v168_v33 = vld [vmem:[%s303_s4] ss:$0 sm:$0xff] }
   0x7   :  { %33 = vperm.xlu0 %219, %v20_v1   ;;  %v30_v23 = vrot.slane %v21_v21, %v29_v19  ;;  %v39_v24 = vrot.slane %v21_v21, %v38_v20 }
   0x9   :  { %203 = vmatpush3.bf16.msra.mxu0 %v202_v8 }
   0xa   :  { %204 = vmatprep.subr.bf16.mxu0 %v223_v2 }
   0xb   :  { %221 = vset.pattern.permute.xlu0 %v227_v32 }
   0xd   :  { %206 = vmatpush3.bf16.msra.mxu0 %v205_v12 }
   0xe   :  { %207 = vmatprep.subr.bf16.mxu0 %v223_v2 }
  0x11   :  { %209 = vmatpush3.bf16.msra.mxu0 %v208_v15 }
  0x81   :  { %v25_v22 = vpop.permute.xlu0 %24 }
  0x82   :  { %v31_v26 = vmul.f32 %v30_v23, %v25_v22 }
  0x86   :  { %v34_v25 = vpop.permute.xlu0 %33 }
  0x87   :  { %v40_v27 = vmul.f32 %v39_v24, %v34_v25 }
  0x89   :  { %v41_v29 = vadd.f32 %v40_v27, %v31_v26 }
  0x8b   :  { %v49_v30 = vadd.f32 %v167_v28, %v41_v29 }
  0x8d   :  { %v50_v31 = vmax.f32 %v49_v30, 0.0 }
  0x8f   :  { %196 = vmatmul.mubr.msk.f32.vlgmr.msra.gmra.mrb[0].mxu0 %vm66_vm1, %v50_v31 }
 0x162   :  { %v136_v34 = vpop.f32.mrb[0].mxu0 }
 0x163   :  { %v137_v35 = vadd.f32 %v168_v33, %v136_v34  ;;  %v197_v36 = vpop.f32.mrb[1].mxu0 }
 0x165   :  { %v141_v37 = vsel %vm140_vm2, %v137_v35, 0.0 }
 0x166   :  { %142 = vadd.xlane.f32.xlu1 %v141_v37 }
 0x177   :  { %156 = vperm.xlu1 %220, %v137_v35  }
 0x1f3   :  { %v143_v38 = vpop.xlane.xlu1 %142 }
 0x1f4   :  { %v144_v39 = vrot.slane %v143_v38, 4 }
 0x1f6   :  { %v145_v40 = vadd.f32 %v144_v39, %v143_v38 }
 0x1f7   :  { %v157_v45 = vpop.permute.xlu1 %156 }
 0x1f8   :  { %v146_v41 = vrot.slane %v145_v40, 2  ;;  %v159_v46 = vadd.f32 %v157_v45, %v137_v35 }
 0x1fa   :  { %v147_v42 = vadd.f32 %v146_v41, %v145_v40 }
 0x1fc   :  { %v148_v43 = vrot.slane %v147_v42, 1 }
 0x1fe   :  { %v149_v44 = vadd.f32 %v148_v43, %v147_v42 }
 0x200   :  { %210 = vpush %v149_v44 }
 0x231   :  { %s211_s2 = spop %210 }
 0x232   :  { %s153_s14 = smul.f32 0.041666668, %s211_s2 }
 0x234   :  { %v160_v47 = vstv %s153_s14 }
 0x235   :  { %v161_v48 = vsub.f32 %v159_v46, %v160_v47 }
 0x237   :  { %162 = vst.msk [vmem:[%s304_s5] sm:$0xff] %vm140_vm2, %v161_v48 }

</bundles_post_ra>
